<compile_context>
chip_gen: v7x
topology: tpu7x:2x2x1
jax: 0.10.0
libtpu: 0.0.40
codegen_flags: <defaults>
</compile_context>

<pallas_src>
import functools

import jax
import jax.numpy as jnp
from jax import lax
from jax.experimental import pallas as pl
from jax.experimental.pallas import tpu as pltpu


# ----------------------------------------------------------------------------
# Weight folding (wrapper side, tiny): same-padded stride-1 conv weights
# (KH, KW, Cin, Cout) -> width-Toeplitz matrices Wmat (KH, W*Cin, W*Cout) with
#     out_row[h] = sum_kh in_row[h + kh] @ Wmat[kh]
# where in_row[h'] is the (W*Cin,) flattening of one H-padded image row.
# Width zero-padding is encoded inside Wmat, so rows never need W halos.
# ----------------------------------------------------------------------------
def fold_conv_weights(w_hwio, W):
    KH, KW, Cin, Cout = w_hwio.shape
    pad = KW // 2
    wi = jnp.arange(W)[:, None]          # input column index
    wo = jnp.arange(W)[None, :]          # output column index
    kw = wi - wo + pad                   # which kernel tap links (wi, wo)
    valid = (kw >= 0) & (kw < KW)
    kw_idx = jnp.clip(kw, 0, KW - 1)
    g = w_hwio[:, kw_idx, :, :]                                # (KH, Wi, Wo, Cin, Cout)
    g = g * valid[None, :, :, None, None].astype(w_hwio.dtype)
    g = jnp.transpose(g, (0, 1, 3, 2, 4))                      # (KH, Wi, Cin, Wo, Cout)
    return g.reshape(KH, W * Cin, W * Cout)


def fold_bias(b, W):
    return jnp.tile(b, W).reshape(1, W * b.shape[0]).astype(jnp.float32)


# ----------------------------------------------------------------------------
# Fused Pallas kernel: three conv layers per batch element, VMEM-resident.
# ----------------------------------------------------------------------------
def _conv_rows(x_rows_bf16, wmat_ref, bias_ref, H):
    """out[h] = sum_kh x_rows[h + kh] @ wmat[kh] + bias  (f32 accumulation)."""
    KH = wmat_ref.shape[0]
    N = wmat_ref.shape[2]
    acc = jnp.zeros((H, N), jnp.float32)
    for kh in range(KH):                                       # static unroll (KH<=3)
        acc = acc + jnp.dot(x_rows_bf16[kh:kh + H, :], wmat_ref[kh],
                            preferred_element_type=jnp.float32)
    return acc + bias_ref[...]


def _fused_backbone_kernel(x_ref, w1_ref, b1_ref, w2_ref, b2_ref,
                           w3_ref, b3_ref, o_ref, a0_ref, a1_ref, *, H):
    # a0/a1: VMEM scratch holding the H-padded (zero halo rows) inputs of
    # layers 1 and 2 in width-folded layout; they never touch HBM.
    a0_ref[...] = jnp.zeros_like(a0_ref)
    a0_ref[1:H + 1, :] = x_ref[0]
    x0 = a0_ref[...].astype(jnp.bfloat16)
    h1 = jnp.maximum(_conv_rows(x0, w1_ref, b1_ref, H), 0.0)     # (H, W*C1) f32

    a1_ref[...] = jnp.zeros_like(a1_ref)
    a1_ref[1:H + 1, :] = h1
    x1 = a1_ref[...].astype(jnp.bfloat16)
    h2 = jnp.maximum(_conv_rows(x1, w2_ref, b2_ref, H), 0.0)     # (H, W*C2) f32

    # 1x1 conv: block-diagonal folded weights, no halo needed.
    h3 = _conv_rows(h2.astype(jnp.bfloat16), w3_ref, b3_ref, H)  # (H, W*C3) f32
    o_ref[0] = h3.astype(o_ref.dtype)


def backbone_pallas(x_rows, folded, *, H, W, Cin, C1, C3):
    N = x_rows.shape[0]
    w1f, b1f, w2f, b2f, w3f, b3f = folded
    kernel = functools.partial(_fused_backbone_kernel, H=H)
    return pl.pallas_call(
        kernel,
        out_shape=jax.ShapeDtypeStruct((N, H, W * C3), jnp.float32),
        grid_spec=pltpu.PrefetchScalarGridSpec(
            num_scalar_prefetch=0,
            grid=(N,),
            in_specs=[
                pl.BlockSpec((1, H, W * Cin), lambda n: (n, 0, 0)),
                pl.BlockSpec(w1f.shape, lambda n: (0, 0, 0)),
                pl.BlockSpec(b1f.shape, lambda n: (0, 0)),
                pl.BlockSpec(w2f.shape, lambda n: (0, 0, 0)),
                pl.BlockSpec(b2f.shape, lambda n: (0, 0)),
                pl.BlockSpec(w3f.shape, lambda n: (0, 0, 0)),
                pl.BlockSpec(b3f.shape, lambda n: (0, 0)),
            ],
            out_specs=pl.BlockSpec((1, H, W * C3), lambda n: (n, 0, 0)),
            scratch_shapes=[
                pltpu.VMEM((H + 2, W * Cin), jnp.float32),   # padded layer-1 input
                pltpu.VMEM((H + 2, W * C1), jnp.float32),    # padded layer-2 input
            ],
        ),
        compiler_params=pltpu.CompilerParams(
            dimension_semantics=("parallel",)),   # v7x: shard batch over 2 TCs
    )(x_rows, w1f, b1f, w2f, b2f, w3f, b3f)


# ----------------------------------------------------------------------------
# Synthetic "backbone" parameters (deterministic init) and forward pass.
# ----------------------------------------------------------------------------
def init_backbone_params(key, cin=4, c1=8, c2=16, cout=16):
    ks = jax.random.split(key, 6)

    def he(k, shape):
        fan_in = shape[0] * shape[1] * shape[2]
        return (jax.random.normal(k, shape, jnp.float32)
                * jnp.sqrt(2.0 / fan_in))

    return {
        "w1": he(ks[0], (3, 3, cin, c1)),
        "b1": 0.01 * jax.random.normal(ks[1], (c1,), jnp.float32),
        "w2": he(ks[2], (3, 3, c1, c2)),
        "b2": 0.01 * jax.random.normal(ks[3], (c2,), jnp.float32),
        "w3": he(ks[4], (1, 1, c2, cout)),
        "b3": 0.01 * jax.random.normal(ks[5], (cout,), jnp.float32),
    }


def modified_maskrcnn_forward(x_nchw, params):
    """Equivalent of ModifiedMaskRCNN.forward: run the backbone on x (NCHW)."""
    N, Cin, H, W = x_nchw.shape
    C1 = params["b1"].shape[0]
    C3 = params["b3"].shape[0]

    # Boundary layout only: PyTorch NCHW -> width-folded rows (N, H, W*Cin).
    # (In a real pipeline keep NHWC end-to-end to drop these two transposes.)
    x_rows = jnp.transpose(x_nchw, (0, 2, 3, 1)).reshape(N, H, W * Cin)

    folded = (
        fold_conv_weights(params["w1"], W).astype(jnp.bfloat16),
        fold_bias(params["b1"], W),
        fold_conv_weights(params["w2"], W).astype(jnp.bfloat16),
        fold_bias(params["b2"], W),
        fold_conv_weights(params["w3"], W).astype(jnp.bfloat16),
        fold_bias(params["b3"], W),
    )
    out_rows = backbone_pallas(x_rows, folded, H=H, W=W, Cin=Cin, C1=C1, C3=C3)
    return jnp.transpose(out_rows.reshape(N, H, W, C3), (0, 3, 1, 2))


# ----------------------------------------------------------------------------
# Pure-JAX reference (lax conv, f32) for correctness checking of the kernel.
# ----------------------------------------------------------------------------
def _ref_forward(x_nchw, params):
    dn = ("NHWC", "HWIO", "NHWC")
    x = jnp.transpose(x_nchw, (0, 2, 3, 1))

    def conv(x, w, b, relu):
        y = lax.conv_general_dilated(x, w, (1, 1), "SAME",
                                     dimension_numbers=dn) + b
        return jnp.maximum(y, 0.0) if relu else y

    x = conv(x, params["w1"], params["b1"], True)
    x = conv(x, params["w2"], params["b2"], True)
    x = conv(x, params["w3"], params["b3"], False)
    return jnp.transpose(x, (0, 3, 1, 2))


if __name__ == "__main__":
    key = jax.random.PRNGKey(0)
    kx, kp = jax.random.split(key)

    # Small synthetic image batch, NCHW like PyTorch: (N=2, C=4, H=16, W=16).
    x = jax.random.normal(kx, (2, 4, 16, 16), jnp.float32)
    params = init_backbone_params(kp)

    out = jax.block_until_ready(modified_maskrcnn_forward(x, params))
    ref = jax.block_until_ready(_ref_forward(x, params))

    assert out.shape == ref.shape == (2, 16, 16, 16), out.shape
    # bf16 MXU operands (f32 accumulation) vs. the f32 lax reference:
    # expect ~1e-2-level absolute error after three stacked layers.
    max_err = float(jnp.max(jnp.abs(out - ref)))
    assert max_err < 1e-1, f"mismatch vs reference: max |err| = {max_err}"

    print("KERNEL_OK")
</pallas_src>

<mosaic_0001>
module attributes {stable_mosaic.version = 11 : i64} {
  func.func @_fused_backbone_kernel(%arg0: i32, %arg1: memref<1x16x64xf32, #tpu.memory_space<vmem>>, %arg2: memref<3x64x128xbf16, #tpu.memory_space<vmem>>, %arg3: memref<1x128xf32, #tpu.memory_space<vmem>>, %arg4: memref<3x128x256xbf16, #tpu.memory_space<vmem>>, %arg5: memref<1x256xf32, #tpu.memory_space<vmem>>, %arg6: memref<1x256x256xbf16, #tpu.memory_space<vmem>>, %arg7: memref<1x256xf32, #tpu.memory_space<vmem>>, %arg8: memref<1x16x256xf32, #tpu.memory_space<vmem>>, %arg9: memref<18x64xf32, #tpu.memory_space<vmem>>, %arg10: memref<18x128xf32, #tpu.memory_space<vmem>>) attributes {dimension_semantics = [#tpu.dimension_semantics<parallel>], iteration_bounds = array<i64: 2>, scalar_prefetch = 0 : i64, scratch_operands = 2 : i64, tpu.core_type = #tpu.core_type<tc>, window_params = [{transform_indices = @transform_0, window_bounds = array<i64: 1, 16, 64>}, {pipeline_mode = #tpu.pipeline_mode<synchronous>, transform_indices = @transform_1, window_bounds = array<i64: 3, 64, 128>}, {pipeline_mode = #tpu.pipeline_mode<synchronous>, transform_indices = @transform_2, window_bounds = array<i64: 1, 128>}, {pipeline_mode = #tpu.pipeline_mode<synchronous>, transform_indices = @transform_3, window_bounds = array<i64: 3, 128, 256>}, {pipeline_mode = #tpu.pipeline_mode<synchronous>, transform_indices = @transform_4, window_bounds = array<i64: 1, 256>}, {pipeline_mode = #tpu.pipeline_mode<synchronous>, transform_indices = @transform_5, window_bounds = array<i64: 1, 256, 256>}, {pipeline_mode = #tpu.pipeline_mode<synchronous>, transform_indices = @transform_6, window_bounds = array<i64: 1, 256>}, {transform_indices = @transform_7, window_bounds = array<i64: 1, 16, 256>}]} {
    %cst = arith.constant 0.000000e+00 : f32
    %0 = vector.broadcast %cst : f32 to vector<18x64xf32>
    %c0 = arith.constant 0 : index
    %c0_0 = arith.constant 0 : index
    %1 = vector.load %arg9[%c0, %c0_0] : memref<18x64xf32, #tpu.memory_space<vmem>>, vector<18x64xf32>
    tpu.vector_store %arg9[%c0, %c0_0], %0 {strides = array<i32>} : memref<18x64xf32, #tpu.memory_space<vmem>>, vector<18x64xf32>,
    %c0_1 = arith.constant 0 : index
    %c0_2 = arith.constant 0 : index
    %c0_3 = arith.constant 0 : index
    %2 = vector.load %arg1[%c0_1, %c0_2, %c0_3] : memref<1x16x64xf32, #tpu.memory_space<vmem>>, vector<1x16x64xf32>
    %3 = vector.shape_cast %2 : vector<1x16x64xf32> to vector<16x64xf32>
    %c1 = arith.constant 1 : index
    %c0_4 = arith.constant 0 : index
    %4 = vector.load %arg9[%c1, %c0_4] : memref<18x64xf32, #tpu.memory_space<vmem>>, vector<16x64xf32>
    tpu.vector_store %arg9[%c1, %c0_4], %3 {strides = array<i32>} : memref<18x64xf32, #tpu.memory_space<vmem>>, vector<16x64xf32>,
    %c0_5 = arith.constant 0 : index
    %c0_6 = arith.constant 0 : index
    %5 = vector.load %arg9[%c0_5, %c0_6] : memref<18x64xf32, #tpu.memory_space<vmem>>, vector<18x64xf32>
    %6 = arith.truncf %5 : vector<18x64xf32> to vector<18x64xbf16>
    %cst_7 = arith.constant 0.000000e+00 : f32
    %7 = vector.broadcast %cst_7 : f32 to vector<16x128xf32>
    %8 = vector.extract_strided_slice %6 {offsets = [0, 0], sizes = [16, 64], strides = [1, 1]} : vector<18x64xbf16> to vector<16x64xbf16>
    %c0_8 = arith.constant 0 : index
    %c0_9 = arith.constant 0 : index
    %c0_10 = arith.constant 0 : index
    %9 = vector.load %arg2[%c0_8, %c0_9, %c0_10] : memref<3x64x128xbf16, #tpu.memory_space<vmem>>, vector<1x64x128xbf16>
    %10 = vector.shape_cast %9 : vector<1x64x128xbf16> to vector<64x128xbf16>
    %cst_11 = arith.constant dense<0.000000e+00> : vector<16x128xf32>
    %11 = tpu.matmul %8, %10, %cst_11 {dimension_numbers = #tpu.dot_dimension_numbers<[1], [0], [0], [1], [0, 0, 1, 1], [], []>} : vector<16x64xbf16>, vector<64x128xbf16>, vector<16x128xf32> -> vector<16x128xf32>
    %12 = arith.addf %7, %11 : vector<16x128xf32>
    %13 = vector.extract_strided_slice %6 {offsets = [1, 0], sizes = [16, 64], strides = [1, 1]} : vector<18x64xbf16> to vector<16x64xbf16>
    %c1_12 = arith.constant 1 : index
    %c0_13 = arith.constant 0 : index
    %c0_14 = arith.constant 0 : index
    %14 = vector.load %arg2[%c1_12, %c0_13, %c0_14] : memref<3x64x128xbf16, #tpu.memory_space<vmem>>, vector<1x64x128xbf16>
    %15 = vector.shape_cast %14 : vector<1x64x128xbf16> to vector<64x128xbf16>
    %cst_15 = arith.constant dense<0.000000e+00> : vector<16x128xf32>
    %16 = tpu.matmul %13, %15, %cst_15 {dimension_numbers = #tpu.dot_dimension_numbers<[1], [0], [0], [1], [0, 0, 1, 1], [], []>} : vector<16x64xbf16>, vector<64x128xbf16>, vector<16x128xf32> -> vector<16x128xf32>
    %17 = arith.addf %12, %16 : vector<16x128xf32>
    %18 = vector.extract_strided_slice %6 {offsets = [2, 0], sizes = [16, 64], strides = [1, 1]} : vector<18x64xbf16> to vector<16x64xbf16>
    %c2 = arith.constant 2 : index
    %c0_16 = arith.constant 0 : index
    %c0_17 = arith.constant 0 : index
    %19 = vector.load %arg2[%c2, %c0_16, %c0_17] : memref<3x64x128xbf16, #tpu.memory_space<vmem>>, vector<1x64x128xbf16>
    %20 = vector.shape_cast %19 : vector<1x64x128xbf16> to vector<64x128xbf16>
    %cst_18 = arith.constant dense<0.000000e+00> : vector<16x128xf32>
    %21 = tpu.matmul %18, %20, %cst_18 {dimension_numbers = #tpu.dot_dimension_numbers<[1], [0], [0], [1], [0, 0, 1, 1], [], []>} : vector<16x64xbf16>, vector<64x128xbf16>, vector<16x128xf32> -> vector<16x128xf32>
    %22 = arith.addf %17, %21 : vector<16x128xf32>
    %c0_19 = arith.constant 0 : index
    %c0_20 = arith.constant 0 : index
    %23 = vector.load %arg3[%c0_19, %c0_20] : memref<1x128xf32, #tpu.memory_space<vmem>>, vector<1x128xf32>
    %24 = vector.broadcast %23 : vector<1x128xf32> to vector<16x128xf32>
    %25 = arith.addf %22, %24 : vector<16x128xf32>
    %cst_21 = arith.constant 0.000000e+00 : f32
    %26 = vector.broadcast %cst_21 : f32 to vector<16x128xf32>
    %27 = arith.maximumf %25, %26 : vector<16x128xf32>
    %cst_22 = arith.constant 0.000000e+00 : f32
    %28 = vector.broadcast %cst_22 : f32 to vector<18x128xf32>
    %c0_23 = arith.constant 0 : index
    %c0_24 = arith.constant 0 : index
    %29 = vector.load %arg10[%c0_23, %c0_24] : memref<18x128xf32, #tpu.memory_space<vmem>>, vector<18x128xf32>
    tpu.vector_store %arg10[%c0_23, %c0_24], %28 {strides = array<i32>} : memref<18x128xf32, #tpu.memory_space<vmem>>, vector<18x128xf32>,
    %c1_25 = arith.constant 1 : index
    %c0_26 = arith.constant 0 : index
    %30 = vector.load %arg10[%c1_25, %c0_26] : memref<18x128xf32, #tpu.memory_space<vmem>>, vector<16x128xf32>
    tpu.vector_store %arg10[%c1_25, %c0_26], %27 {strides = array<i32>} : memref<18x128xf32, #tpu.memory_space<vmem>>, vector<16x128xf32>,
    %c0_27 = arith.constant 0 : index
    %c0_28 = arith.constant 0 : index
    %31 = vector.load %arg10[%c0_27, %c0_28] : memref<18x128xf32, #tpu.memory_space<vmem>>, vector<18x128xf32>
    %32 = arith.truncf %31 : vector<18x128xf32> to vector<18x128xbf16>
    %cst_29 = arith.constant 0.000000e+00 : f32
    %33 = vector.broadcast %cst_29 : f32 to vector<16x256xf32>
    %34 = vector.extract_strided_slice %32 {offsets = [0, 0], sizes = [16, 128], strides = [1, 1]} : vector<18x128xbf16> to vector<16x128xbf16>
    %c0_30 = arith.constant 0 : index
    %c0_31 = arith.constant 0 : index
    %c0_32 = arith.constant 0 : index
    %35 = vector.load %arg4[%c0_30, %c0_31, %c0_32] : memref<3x128x256xbf16, #tpu.memory_space<vmem>>, vector<1x128x256xbf16>
    %36 = vector.shape_cast %35 : vector<1x128x256xbf16> to vector<128x256xbf16>
    %cst_33 = arith.constant dense<0.000000e+00> : vector<16x256xf32>
    %37 = tpu.matmul %34, %36, %cst_33 {dimension_numbers = #tpu.dot_dimension_numbers<[1], [0], [0], [1], [0, 0, 1, 1], [], []>} : vector<16x128xbf16>, vector<128x256xbf16>, vector<16x256xf32> -> vector<16x256xf32>
    %38 = arith.addf %33, %37 : vector<16x256xf32>
    %39 = vector.extract_strided_slice %32 {offsets = [1, 0], sizes = [16, 128], strides = [1, 1]} : vector<18x128xbf16> to vector<16x128xbf16>
    %c1_34 = arith.constant 1 : index
    %c0_35 = arith.constant 0 : index
    %c0_36 = arith.constant 0 : index
    %40 = vector.load %arg4[%c1_34, %c0_35, %c0_36] : memref<3x128x256xbf16, #tpu.memory_space<vmem>>, vector<1x128x256xbf16>
    %41 = vector.shape_cast %40 : vector<1x128x256xbf16> to vector<128x256xbf16>
    %cst_37 = arith.constant dense<0.000000e+00> : vector<16x256xf32>
    %42 = tpu.matmul %39, %41, %cst_37 {dimension_numbers = #tpu.dot_dimension_numbers<[1], [0], [0], [1], [0, 0, 1, 1], [], []>} : vector<16x128xbf16>, vector<128x256xbf16>, vector<16x256xf32> -> vector<16x256xf32>
    %43 = arith.addf %38, %42 : vector<16x256xf32>
    %44 = vector.extract_strided_slice %32 {offsets = [2, 0], sizes = [16, 128], strides = [1, 1]} : vector<18x128xbf16> to vector<16x128xbf16>
    %c2_38 = arith.constant 2 : index
    %c0_39 = arith.constant 0 : index
    %c0_40 = arith.constant 0 : index
    %45 = vector.load %arg4[%c2_38, %c0_39, %c0_40] : memref<3x128x256xbf16, #tpu.memory_space<vmem>>, vector<1x128x256xbf16>
    %46 = vector.shape_cast %45 : vector<1x128x256xbf16> to vector<128x256xbf16>
    %cst_41 = arith.constant dense<0.000000e+00> : vector<16x256xf32>
    %47 = tpu.matmul %44, %46, %cst_41 {dimension_numbers = #tpu.dot_dimension_numbers<[1], [0], [0], [1], [0, 0, 1, 1], [], []>} : vector<16x128xbf16>, vector<128x256xbf16>, vector<16x256xf32> -> vector<16x256xf32>
    %48 = arith.addf %43, %47 : vector<16x256xf32>
    %c0_42 = arith.constant 0 : index
    %c0_43 = arith.constant 0 : index
    %49 = vector.load %arg5[%c0_42, %c0_43] : memref<1x256xf32, #tpu.memory_space<vmem>>, vector<1x256xf32>
    %50 = vector.broadcast %49 : vector<1x256xf32> to vector<16x256xf32>
    %51 = arith.addf %48, %50 : vector<16x256xf32>
    %cst_44 = arith.constant 0.000000e+00 : f32
    %52 = vector.broadcast %cst_44 : f32 to vector<16x256xf32>
    %53 = arith.maximumf %51, %52 : vector<16x256xf32>
    %54 = arith.truncf %53 : vector<16x256xf32> to vector<16x256xbf16>
    %cst_45 = arith.constant 0.000000e+00 : f32
    %55 = vector.broadcast %cst_45 : f32 to vector<16x256xf32>
    %c0_46 = arith.constant 0 : index
    %c0_47 = arith.constant 0 : index
    %c0_48 = arith.constant 0 : index
    %56 = vector.load %arg6[%c0_46, %c0_47, %c0_48] : memref<1x256x256xbf16, #tpu.memory_space<vmem>>, vector<1x256x256xbf16>
    %57 = vector.shape_cast %56 : vector<1x256x256xbf16> to vector<256x256xbf16>
    %cst_49 = arith.constant dense<0.000000e+00> : vector<16x256xf32>
    %58 = tpu.matmul %54, %57, %cst_49 {dimension_numbers = #tpu.dot_dimension_numbers<[1], [0], [0], [1], [0, 0, 1, 1], [], []>} : vector<16x256xbf16>, vector<256x256xbf16>, vector<16x256xf32> -> vector<16x256xf32>
    %59 = arith.addf %55, %58 : vector<16x256xf32>
    %c0_50 = arith.constant 0 : index
    %c0_51 = arith.constant 0 : index
    %60 = vector.load %arg7[%c0_50, %c0_51] : memref<1x256xf32, #tpu.memory_space<vmem>>, vector<1x256xf32>
    %61 = vector.broadcast %60 : vector<1x256xf32> to vector<16x256xf32>
    %62 = arith.addf %59, %61 : vector<16x256xf32>
    %c0_52 = arith.constant 0 : index
    %c0_53 = arith.constant 0 : index
    %c0_54 = arith.constant 0 : index
    %63 = vector.load %arg8[%c0_52, %c0_53, %c0_54] : memref<1x16x256xf32, #tpu.memory_space<vmem>>, vector<1x16x256xf32>
    %64 = vector.shape_cast %63 : vector<1x16x256xf32> to vector<16x256xf32>
    %65 = vector.shape_cast %62 : vector<16x256xf32> to vector<1x16x256xf32>
    tpu.vector_store %arg8[%c0_52, %c0_53, %c0_54], %65 {strides = array<i32>} : memref<1x16x256xf32, #tpu.memory_space<vmem>>, vector<1x16x256xf32>,
    return
  }
  func.func @transform_0(%arg0: i32) -> (i32, i32, i32) {
    %c0_i32 = arith.constant 0 : i32
    %c0_i32_0 = arith.constant 0 : i32
    %c0_i32_1 = arith.constant 0 : i32
    return %arg0, %c0_i32, %c0_i32_0 : i32, i32, i32
  }
  func.func @transform_1(%arg0: i32) -> (i32, i32, i32) {
    %c0_i32 = arith.constant 0 : i32
    %c0_i32_0 = arith.constant 0 : i32
    %c0_i32_1 = arith.constant 0 : i32
    %c0_i32_2 = arith.constant 0 : i32
    return %c0_i32, %c0_i32_0, %c0_i32_1 : i32, i32, i32
  }
  func.func @transform_2(%arg0: i32) -> (i32, i32) {
    %c0_i32 = arith.constant 0 : i32
    %c0_i32_0 = arith.constant 0 : i32
    %c0_i32_1 = arith.constant 0 : i32
    return %c0_i32, %c0_i32_0 : i32, i32
  }
  func.func @transform_3(%arg0: i32) -> (i32, i32, i32) {
    %c0_i32 = arith.constant 0 : i32
    %c0_i32_0 = arith.constant 0 : i32
    %c0_i32_1 = arith.constant 0 : i32
    %c0_i32_2 = arith.constant 0 : i32
    return %c0_i32, %c0_i32_0, %c0_i32_1 : i32, i32, i32
  }
  func.func @transform_4(%arg0: i32) -> (i32, i32) {
    %c0_i32 = arith.constant 0 : i32
    %c0_i32_0 = arith.constant 0 : i32
    %c0_i32_1 = arith.constant 0 : i32
    return %c0_i32, %c0_i32_0 : i32, i32
  }
  func.func @transform_5(%arg0: i32) -> (i32, i32, i32) {
    %c0_i32 = arith.constant 0 : i32
    %c0_i32_0 = arith.constant 0 : i32
    %c0_i32_1 = arith.constant 0 : i32
    %c0_i32_2 = arith.constant 0 : i32
    return %c0_i32, %c0_i32_0, %c0_i32_1 : i32, i32, i32
  }
  func.func @transform_6(%arg0: i32) -> (i32, i32) {
    %c0_i32 = arith.constant 0 : i32
    %c0_i32_0 = arith.constant 0 : i32
    %c0_i32_1 = arith.constant 0 : i32
    return %c0_i32, %c0_i32_0 : i32, i32
  }
  func.func @transform_7(%arg0: i32) -> (i32, i32, i32) {
    %c0_i32 = arith.constant 0 : i32
    %c0_i32_0 = arith.constant 0 : i32
    %c0_i32_1 = arith.constant 0 : i32
    return %arg0, %c0_i32, %c0_i32_0 : i32, i32, i32
  }
}

</mosaic_0001>

<bundles_post_ra>
// kernel: tpu_custom_call.1
= control target key start
LH: loop header
LB: loop body
LE: loop exit
PB: predicated region body
PF: predicated region fallthrough
CT: control target
= control target key end

     0   :  { %s2417_s0 = inlined_call_operand.hbm [shape: f32[2,16,64], index: 0, kind: input, shape index: {}]   ;;  %s2418_s1 = inlined_call_operand.hbm [shape: bf16[3,64,128], index: 1, kind: input, shape index: {}]   ;;  %s2419_s2 = inlined_call_operand.vmem [shape: f32[1,128], index: 2, kind: input, shape index: {}]   ;;  %s2420_s3 = inlined_call_operand.hbm [shape: bf16[3,128,256], index: 3, kind: input, shape index: {}]   ;;  %s2421_s4 = inlined_call_operand.vmem [shape: f32[1,256], index: 4, kind: input, shape index: {}]   ;;  %s2422_s5 = inlined_call_operand.hbm [shape: bf16[1,256,256], index: 5, kind: input, shape index: {}]   ;;  %s2423_s6 = inlined_call_operand.vmem [shape: f32[1,256], index: 6, kind: input, shape index: {}]   ;;  %s2424_s7 = inlined_call_operand.hbm [shape: f32[2,16,256], index: 7, kind: output, shape index: {}]  }
   0x1   :  { %2429 = sst [smem:[#allocation18_spill]] %s2418_s1 }
   0x2   :  { %12 = vsyncpa [#allocation5], 0 }
   0x3   :  { %14 = vsyncpa [#allocation5 + $0x1], 0 }
   0x4   :  { %15 = vsyncpa [#allocation8], 0 }
   0x5   :  { %16 = vsyncpa [#allocation11], 0 }
   0x6   :  { %17 = vsyncpa [#allocation6], 0 }
   0x7   :  { %19 = vsyncpa [#allocation6 + $0x1], 0  ;;  %s2097_s24 = smov 0   ;;  %s2099_s25 = smov 0  }
   0x8   :  { %s2101_s26 = smov 0   ;;  %s2103_s27 = smov 0  }
   0x9 LB: > { %s2118_s28 = sadd.s32 4294967295, %s2041_s27   ;;  %s1458_s29 = sadd.s32 4294967294, %s2041_s27   ;;  %s2041_s27 = sphi %s2103_s27, %s2452_s27   ;;  %s2037_s26 = sphi %s2101_s26, %s2451_s26   ;;  %s2033_s25 = sphi %s2099_s25, %s2450_s25   ;;  %s2029_s24 = sphi %s2097_s24, %s2449_s24  }
   0xa   : > { %p45_p0 = scmp.ne.s32.totalorder %s2033_s25, %s2029_s24  ;;  %p2425_p1 = scmp.eq.s32.totalorder %s2118_s28, 0 }
   0xb   : > { %p201_p3 = scmp.eq.s32.totalorder %s1458_s29, 1  ;;  %p1459_p5 = scmp.ge.s32.totalorder %s2041_s27, 1 }
   0xc   : > { %p2127_p4 = por %p2425_p1, %p45_p0  ;;  %p208_p7 = scmp.lt.s32.totalorder %s2041_s27, 3 }
   0xd   : > { %p2132_p6 = por %p201_p3, %p45_p0  ;;  %s2043_s10 = smov [#allocation7]  }
   0xe   : > { %s2430_s30 = scalar_select %p2127_p4, 1, 0 }
   0xf   : > { %s2431_s8 = scalar_select %p2132_p6, 1, 0 }
  0x10   : > { %p2137_p8 = pnand %p1459_p5, %p208_p7  ;;  %s220_s11 = sshll.u32 %s2043_s10, 4  ;;  %s2141_s11 = int_to_ptr.vmem [resolvable:$true] %s220_s11 }
  0x11   : > { %2432 = sst [smem:[#allocation17_spill]] %s2431_s8  ;;  %s2044_s13 = smov [#allocation9]  }
  0x12   : > { %s2433_s9 = scalar_select %p2137_p8, 1, 0 }
  0x13   : > { %p1651_p9 = pneg %p2137_p8  ;;  %s236_s14 = sshll.u32 %s2044_s13, 4  ;;  %s2152_s14 = int_to_ptr.vmem [resolvable:$true] %s236_s14 }
  0x14   : > { %s2435_s1 = sld [smem:[#allocation18_spill]] }
  0x15   : > { %p2148_p11 = pnand %p1651_p9, %p2425_p1 }
  0x17   : > { %p2162_p13 = pneg %p2148_p11 }
  0x1a   : > { %s1853_s17 = scalar_lea.hbm %s2435_s1, 1536 }
  0x1b   : > { %p1854_p12 = scmp.ne.s32.totalorder %s2435_s1, %s1853_s17  ;;  %p1860_p5 = scmp.lt.u32.totalorder %s1853_s17, %s2435_s1 }
  0x1d   : > { %p1856_p0 = pnand %p2162_p13, %p1854_p12 }
  0x1f   : > { %p1857_p3 = pneg %p1856_p0 }
  0x21   : > { %p1862_p7 = pnand %p1860_p5, %p1857_p3 }
  0x23   : > { %1865 = shalt.err (!%p1862_p7)
}
  0x24   : > { %s1866_s23 = scalar_lea.vmem %s2141_s11, 1536  ;;  %p1874_p2 = scmp.lt.s32.totalorder %s2141_s11, %s2141_s11 }
  0x25   : > { %p1867_p9 = scmp.ne.s32.totalorder %s2141_s11, %s1866_s23  ;;  %p1875_p6 = scmp.lt.s32.totalorder %s1866_s23, %s1866_s23 }
  0x27   : > { %p1869_p10 = pnand %p1867_p9, %p2162_p13  ;;  %p1876_p12 = por %p1875_p6, %p1874_p2 }
  0x29   : > { %p1870_p1 = pneg %p1869_p10 }
  0x2b   : > { %p1877_p0 = pnand %p1876_p12, %p1870_p1 }
  0x2d   : > { %1880 = shalt.err (!%p1877_p0)
}
  0x2e   : > { %s2045_s29 = smov 64   ;;  %s2046_s10 = smov 4  }
  0x2f   : > { %1654 = dma.hbm_to_vmem [thread:$0]  (!%p2148_p11), %s2435_s1, 1536, %s2141_s11, [#allocation8], %s2045_s29, %s2045_s29, %s2046_s10  }
  0x30   : > { %s1881_s18 = scalar_lea.hbm %s2420_s3, 6144 }
  0x31   : > { %p1882_p2 = scmp.ne.s32.totalorder %s2420_s3, %s1881_s18  ;;  %p1888_p10 = scmp.lt.u32.totalorder %s1881_s18, %s2420_s3 }
  0x33   : > { %p1884_p1 = pnand %p1882_p2, %p2162_p13 }
  0x35   : > { %p1885_p6 = pneg %p1884_p1 }
  0x37   : > { %p1890_p3 = pnand %p1888_p10, %p1885_p6 }
  0x39   : > { %1893 = shalt.err (!%p1890_p3)
}
  0x3a   : > { %s1894_s11 = scalar_lea.vmem %s2152_s14, 6144  ;;  %p1902_p12 = scmp.lt.s32.totalorder %s2152_s14, %s2152_s14 }
  0x3b   : > { %p1895_p5 = scmp.ne.s32.totalorder %s2152_s14, %s1894_s11  ;;  %p1903_p0 = scmp.lt.s32.totalorder %s1894_s11, %s1894_s11 }
  0x3d   : > { %p1897_p7 = pnand %p1895_p5, %p2162_p13  ;;  %p1904_p2 = por %p1903_p0, %p1902_p12 }
  0x3f   : > { %p1898_p9 = pneg %p1897_p7 }
  0x41   : > { %p1905_p1 = pnand %p1904_p2, %p1898_p9 }
  0x43   : > { %1908 = shalt.err (!%p1905_p1)
}
  0x44   : > { %s2047_s29 = smov 128   ;;  %s2048_s10 = smov 8  }
  0x45   : > { %1657 = dma.hbm_to_vmem [thread:$0]  (!%p2148_p11), %s2420_s3, 6144, %s2152_s14, [#allocation8], %s2047_s29, %s2047_s29, %s2048_s10  }
  0x46   : > { %s2049_s16 = smov [#allocation10]   ;;  %s2210_s18 = sadd.s32 1, %s2041_s27  }
  0x47   : > { %s252_s17 = sshll.u32 %s2049_s16, 4  ;;  %s1909_s22 = scalar_lea.hbm %s2422_s5, 4096  ;;  %s253_s17 = int_to_ptr.vmem [resolvable:$true] %s252_s17 }
  0x48   : > { %p1910_p6 = scmp.ne.s32.totalorder %s2422_s5, %s1909_s22  ;;  %p1916_p5 = scmp.lt.u32.totalorder %s1909_s22, %s2422_s5 }
  0x4a   : > { %p1912_p10 = pnand %p1910_p6, %p2162_p13 }
  0x4c   : > { %p1913_p3 = pneg %p1912_p10 }
  0x4e   : > { %p1918_p7 = pnand %p1916_p5, %p1913_p3 }
  0x50   : > { %1921 = shalt.err (!%p1918_p7)
}
  0x51   : > { %s1922_s14 = scalar_lea.vmem %s253_s17, 4096  ;;  %p1930_p2 = scmp.lt.s32.totalorder %s253_s17, %s253_s17 }
  0x52   : > { %p1923_p9 = scmp.ne.s32.totalorder %s253_s17, %s1922_s14  ;;  %p1931_p1 = scmp.lt.s32.totalorder %s1922_s14, %s1922_s14 }
  0x54   : > { %p1925_p12 = pnand %p1923_p9, %p2162_p13  ;;  %p1932_p4 = por %p1931_p1, %p1930_p2 }
  0x56   : > { %p1926_p0 = pneg %p1925_p12 }
  0x58   : > { %p1933_p8 = pnand %p1932_p4, %p1926_p0 }
  0x5a   : > { %1936 = shalt.err (!%p1933_p8)
}
  0x5b   : > { %1660 = dma.hbm_to_vmem [thread:$0]  (!%p2148_p11), %s2422_s5, 4096, %s253_s17, [#allocation11], %s2047_s29, %s2047_s29, %s2048_s10  }
  0x5c   : > { %s29_s20 = ssub.s32 %s2041_s27, %s2210_s18  ;;  %s32_s12 = sadd.s32 1, %s2037_s26 }
  0x5d   : > { %p30_p4 = scmp.eq.s32.totalorder %s29_s20, 0  ;;  %p39_p8 = scmp.ne.s32.totalorder %s2037_s26, %s2033_s25 }
  0x5e   : > { %p40_p13 = scmp.eq.s32.totalorder %s2041_s27, 0  ;;  %p1672_p6 = scmp.lt.s32.totalorder %s2041_s27, 2 }
  0x5f   : > { %s2241_s13 = scalar_select %p30_p4, %s2037_s26, %s32_s12  }
  0x60   : > { %p41_p10 = por %p40_p13, %p39_p8  ;;  %p2437_p3 = scmp.eq.s32.totalorder %s2118_s28, 1 }
  0x61   : > { %s269_s16 = sand.u32 1, %s2037_s26   ;;  %s1574_s19 = sshll.u32 %s2041_s27, 8 }
  0x62   : > { %p2245_p5 = por %p2437_p3, %p39_p8  ;;  %s1464_s21 = sshll.u32 %s269_s16, 4 }
  0x63   : > { %s2254_s17 = scalar_lea.hbm %s2417_s0, %s1574_s19  ;;  %s273_s11 = scalar_lea.vmem [#allocation4], %s1464_s21 }
  0x64   : > { %s280_s14 = sshll.u32 %s273_s11, 4  ;;  %p2256_p11 = pnand %p1672_p6, %p41_p10  ;;  %s2260_s14 = int_to_ptr.vmem [resolvable:$true] %s280_s14 }
  0x65   : > { %s2262_s8 = scalar_lea.sflag [#allocation5], %s269_s16  ;;  %s1937_s20 = scalar_lea.hbm %s2254_s17, 256 }
  0x66   : > { %p1938_p7 = scmp.ne.s32.totalorder %s2254_s17, %s1937_s20  ;;  %p1939_p9 = pneg %p2256_p11 }
  0x67   : > { %s1942_s21 = scalar_lea.hbm %s2417_s0, 512  ;;  %p1943_p2 = scmp.lt.u32.totalorder %s2254_s17, %s2417_s0 }
  0x68   : > { %p1940_p12 = pnand %p1939_p9, %p1938_p7  ;;  %p1944_p1 = scmp.lt.u32.totalorder %s1942_s21, %s1937_s20 }
  0x69   : > { %p1946_p8 = scmp.lt.u32.totalorder %s1937_s20, %s2254_s17 }
  0x6a   : > { %p1941_p0 = pneg %p1940_p12  ;;  %p1945_p4 = por %p1944_p1, %p1943_p2 }
  0x6c   : > { %p1947_p13 = por %p1946_p8, %p1945_p4 }
  0x6e   : > { %p1948_p6 = pnand %p1947_p13, %p1941_p0 }
  0x70   : > { %1951 = shalt.err (!%p1948_p6)
}
  0x71   : > { %s1952_s16 = scalar_lea.vmem %s2260_s14, 256  ;;  %s2050_s11 = smov [#allocation4]  }
  0x72   : > { %p1953_p10 = scmp.ne.s32.totalorder %s2260_s14, %s1952_s16  ;;  %s1957_s12 = sshll.u32 %s2050_s11, 4  ;;  %s1958_s12 = int_to_ptr.vmem [resolvable:$false] %s1957_s12 }
  0x73   : > { %s1959_s19 = scalar_lea.vmem %s1958_s12, 512  ;;  %p1960_p12 = scmp.lt.s32.totalorder %s2260_s14, %s1958_s12 }
  0x74   : > { %p1955_p3 = pnand %p1953_p10, %p1939_p9  ;;  %p1961_p2 = scmp.lt.s32.totalorder %s1959_s19, %s1952_s16 }
  0x76   : > { %p1956_p7 = pneg %p1955_p3  ;;  %p1962_p1 = por %p1961_p2, %p1960_p12 }
  0x78   : > { %p1963_p4 = pnand %p1962_p1, %p1956_p7 }
  0x7a   : > { %1966 = shalt.err (!%p1963_p4)
}
  0x7b   : > { %1664 = dma.hbm_to_vmem [thread:$0]  (!%p2256_p11), %s2254_s17, 256, %s2260_s14, %s2262_s8, %s2047_s29, %s2047_s29, %s2048_s10  }
  0x7c   : > { %p2440_p9 = scmp.ne.s32.totalorder %s2433_s9, 0 }
  0x7d   : > { %s2296_s20 = sand.u32 (!%p2440_p9), 1, %s2033_s25   ;;  %p2441_p0 = scmp.ne.s32.totalorder (!%p2440_p9), %s2430_s30, 0 }
  0x7e   : > { %292 = sbr.rel (%p2440_p9) target bundleno = 935 (0x3a7), region = 48  ;;  %s1468_s21 = sshll.u32 (!%p2440_p9), %s2296_s20, 4 }
  0x7f   : > { %s295_s22 = scalar_lea.sflag (!%p2440_p9), [#allocation5], %s2296_s20  ;;  %s2300_s23 = scalar_lea.vmem (!%p2440_p9), [#allocation4], %s1468_s21 }
  0x85   : > { %2012 = dma.done.wait (%p2441_p0), %s295_s22, 256  }
  0x86   : > { %2014 = vsyncadd (%p2441_p0), %s295_s22, 4294967040  ;;  %p2442_p11 = scmp.eq.s32.totalorder %s2118_s28, 0 }
  0x88   : > { %2016 = dma.done.wait (%p2442_p11), [#allocation8], 7680   ;;  %p2443_p8 = pmov %p2442_p11 }
  0x8a   : > { %2018 = vsyncadd (%p2443_p8), [#allocation8], 4294959616  ;;  %p2444_p13 = pmov %p2443_p8 }
  0x8b   : > { %p2445_p6 = pmov %p2443_p8 }
  0x8c   : > { %2020 = dma.done.wait (%p2444_p13), [#allocation11], 4096  }
  0x8d   : > { %2022 = vsyncadd (%p2445_p6), [#allocation11], 4294963200  ;;  %vm342_vm0 = vcmask 523264   ;;  %vm345_vm1 = vcmask 517120   ;;  %v2051_v0 = vmov 0.0   ;;  %vm2052_vm2 = vmmov 0  }
  0x8e   : > { %1591 = vmatprep.subr.bf16.mxu0 %v2051_v0  ;;  %617 = vst [vmem:[#allocation3] sm:$0xff] %v2051_v0  ;;  %618 = vst [vmem:[#allocation3 + $0x8] sm:$0xff] %v2051_v0  ;;  %1603 = vmatprep.subr.bf16.mxu1 %v2051_v0  ;;  %v1721_v1 = vld [vmem:[#allocation7 + $0x20] sm:$0xff]   ;;  %v1723_v3 = vld [vmem:[#allocation7 + $0x28] sm:$0xff]   ;;  %vm373_vm3 = vsmask.f32 7424 }
  0x8f   : > { %619 = vst [vmem:[#allocation3 + $0x10] sm:$0x3] %v2051_v0  ;;  %343 = vst.msk [vmem:[#allocation2] sm:$0xff] %vm342_vm0, %v2051_v0  ;;  %1599 = vmatprep.mubr.msk.bf16.mxu0 %vm2052_vm2, %v2051_v0  ;;  %1611 = vmatprep.mubr.msk.bf16.mxu1 %vm2052_vm2, %v2051_v0  ;;  %v1722_v2 = vld [vmem:[#allocation7] sm:$0xff]   ;;  %v1724_v4 = vld [vmem:[#allocation7 + $0x8] sm:$0xff]   ;;  %vm532_vm4 = vcmask 1046528  }
  0x90   : > { %344 = vst.msk [vmem:[#allocation2 + $0x8] sm:$0xff] %vm342_vm0, %v2051_v0  ;;  %1592 = vmatpush3.bf16.msra.mxu0 %v1721_v1  ;;  %1604 = vmatpush3.bf16.msra.mxu1 %v1722_v2  ;;  %v1725_v5 = vld [vmem:[#allocation7 + $0x30] sm:$0xff]   ;;  %v348_v8 = vld [vmem:[%s2300_s23 + $0x8] sm:$0xff]  ;;  %v1729_v21 = vld [vmem:[#allocation7 + $0x40] sm:$0xff]   ;;  %v2053_v43 = vmov 0   ;;  %s1472_s1 = sshll.u32 %s2296_s20, 5 }
  0x91   : > { %346 = vst.msk [vmem:[#allocation2 + $0x10] sm:$0x3] %vm345_vm1, %v2051_v0  ;;  %1593 = vmatprep.subr.bf16.mxu0 %v2051_v0  ;;  %1605 = vmatprep.subr.bf16.mxu1 %v2051_v0  ;;  %v1726_v6 = vld [vmem:[#allocation7 + $0x10] sm:$0xff]   ;;  %v1727_v9 = vld [vmem:[#allocation7 + $0x38] sm:$0xff]   ;;  %v1730_v24 = vld [vmem:[#allocation7 + $0x48] sm:$0xff]   ;;  %s340_s8 = scalar_lea.vmem [#allocation12], %s1472_s1 }
  0x92   : > { %v347_v7 = vld [vmem:[%s2300_s23] sm:$0xff]  ;;  %350 = vst.msk [vmem:[#allocation2 + $0x9] sm:$0xff] %vm342_vm0, %v348_v8  ;;  %v1728_v10 = vld [vmem:[#allocation7 + $0x18] sm:$0xff]   ;;  %s1356_s16 = sshll.u32 %s340_s8, 4  ;;  %s1575_s11 = sshll.u32 %s2118_s28, 9  ;;  %s2368_s16 = int_to_ptr.vmem [resolvable:$true] %s1356_s16 }
  0x93   : > { %349 = vst.msk [vmem:[#allocation2 + $0x1] sm:$0xff] %vm342_vm0, %v347_v7  ;;  %v1731_v25 = vld [vmem:[#allocation7 + $0x50] sm:$0xff]   ;;  %v1732_v26 = vld [vmem:[#allocation7 + $0x58] sm:$0xff]   ;;  %v1733_v30 = vld [vmem:[#allocation9 + $0x80] ss:$8 sps:$4 sm:$0xff]   ;;  %s2373_s21 = scalar_lea.hbm %s2424_s7, %s1575_s11  ;;  %s1343_s28 = scalar_lea.sflag [#allocation6], %s2296_s20 }
  0x94   : > { %1594 = vmatpush3.bf16.msra.mxu0 %v1723_v3  ;;  %1606 = vmatpush3.bf16.msra.mxu1 %v1724_v4  ;;  %v1735_v31 = vld [vmem:[#allocation9 + $0x84] ss:$8 sps:$4 sm:$0xff]   ;;  %v1738_v32 = vld [vmem:[#allocation9 + $0x94] ss:$8 sps:$4 sm:$0xff]   ;;  %v1736_v33 = vld [vmem:[#allocation9 + $0x90] ss:$8 sps:$4 sm:$0xff]  }
  0x95   : > { %1595 = vmatprep.subr.bf16.mxu0 %v2051_v0  ;;  %1607 = vmatprep.subr.bf16.mxu1 %v2051_v0  ;;  %v1741_v34 = vld [vmem:[#allocation9 + $0xa4] ss:$8 sps:$4 sm:$0xff]   ;;  %v1739_v35 = vld [vmem:[#allocation9 + $0xa0] ss:$8 sps:$4 sm:$0xff]   ;;  %v1744_v36 = vld [vmem:[#allocation9 + $0xb4] ss:$8 sps:$4 sm:$0xff]  }
  0x96   : > { %v1742_v37 = vld [vmem:[#allocation9 + $0xb0] ss:$8 sps:$4 sm:$0xff]   ;;  %v1747_v38 = vld [vmem:[#allocation9 + $0xc4] ss:$8 sps:$4 sm:$0xff]   ;;  %v1745_v39 = vld [vmem:[#allocation9 + $0xc0] ss:$8 sps:$4 sm:$0xff]  }
  0x97   : > { %v1750_v40 = vld [vmem:[#allocation9 + $0xd4] ss:$8 sps:$4 sm:$0xff]   ;;  %v1748_v41 = vld [vmem:[#allocation9 + $0xd0] ss:$8 sps:$4 sm:$0xff]   ;;  %v1753_v42 = vld [vmem:[#allocation9 + $0xe4] ss:$8 sps:$4 sm:$0xff]  }
  0x98   : > { %1596 = vmatpush3.bf16.msra.mxu0 %v1725_v5  ;;  %1608 = vmatpush3.bf16.msra.mxu1 %v1726_v6  ;;  %v1751_v44 = vld [vmem:[#allocation9 + $0xe0] ss:$8 sps:$4 sm:$0xff]   ;;  %v1756_v45 = vld [vmem:[#allocation9 + $0xf4] ss:$8 sps:$4 sm:$0xff]   ;;  %v1754_v46 = vld [vmem:[#allocation9 + $0xf0] ss:$8 sps:$4 sm:$0xff]  }
  0x99   : > { %1597 = vmatprep.subr.bf16.mxu0 %v2051_v0  ;;  %1609 = vmatprep.subr.bf16.mxu1 %v2051_v0  ;;  %v353_v13 = vld [vmem:[#allocation2 + $0x10] sm:$0x3]  ;;  %v1759_v47 = vld [vmem:[#allocation9 + $0x4] ss:$8 sps:$4 sm:$0xff]   ;;  %v1810_v50 = vld [vmem:[#allocation10 + $0x14] ss:$8 sps:$4 sm:$0xff]  }
  0x9a   : > { %v351_v11 = vld [vmem:[#allocation2] sm:$0xff]  ;;  %v352_v12 = vld [vmem:[#allocation2 + $0x8] sm:$0xff]  ;;  %v355_v15 = vpack.c.bf16 %v353_v13, %v353_v13  ;;  %v1805_v48 = vld [vmem:[#allocation10] ss:$8 sps:$4 sm:$0xff]   ;;  %s1967_s22 = scalar_lea.vmem %s2368_s16, 512  ;;  %s2054_s23 = smov [#allocation12]  }
  0x9b   : > { %v354_v14 = vpack.c.bf16 %v352_v12, %v351_v11  ;;  %v1807_v49 = vld [vmem:[#allocation10 + $0x4] ss:$8 sps:$4 sm:$0xff]   ;;  %v1808_v51 = vld [vmem:[#allocation10 + $0x10] ss:$8 sps:$4 sm:$0xff]   ;;  %v1811_v53 = vld [vmem:[#allocation10 + $0x20] ss:$8 sps:$4 sm:$0xff]   ;;  %p1968_p10 = scmp.ne.s32.totalorder %s2368_s16, %s1967_s22 }
  0x9c   : > { %1598 = vmatpush3.bf16.msra.mxu0 %v1727_v9  ;;  %1610 = vmatpush3.bf16.msra.mxu1 %v1728_v10  ;;  %v382_v18 = vshll.u32 %v355_v15, 16  ;;  %v534_v28 = vrot.slane %v355_v15, 1  ;;  %v1813_v52 = vld [vmem:[#allocation10 + $0x24] ss:$8 sps:$4 sm:$0xff]   ;;  %v1816_v54 = vld [vmem:[#allocation10 + $0x34] ss:$8 sps:$4 sm:$0xff]  }
  0x9d   : > { %1615 = vmatprep.subr.bf16.mxu0 %v2051_v0  ;;  %v375_v16 = vshrl.u32 %v354_v14, 16  ;;  %v377_v17 = vshll.u32 %v354_v14, 16  ;;  %v533_v27 = vrot.slane %v354_v14, 1  ;;  %753 = vmatprep.subr.bf16.mxu1 %v1735_v31  ;;  %v1814_v55 = vld [vmem:[#allocation10 + $0x30] ss:$8 sps:$4 sm:$0xff]   ;;  %p1969_p3 = pnand %p1968_p10, %p2245_p5  ;;  %s1971_s30 = sshll.u32 %s2054_s23, 4  ;;  %s1972_s30 = int_to_ptr.vmem [resolvable:$false] %s1971_s30 }
  0x9e   : > { %v384_v20 = vrot.slane %v382_v18, 1  ;;  %v1819_v56 = vld [vmem:[#allocation10 + $0x44] ss:$8 sps:$4 sm:$0xff]   ;;  %v1817_v58 = vld [vmem:[#allocation10 + $0x40] ss:$8 sps:$4 sm:$0xff]   ;;  %s1973_s9 = scalar_lea.vmem %s1972_s30, 1024  ;;  %p1974_p12 = scmp.lt.s32.totalorder %s2368_s16, %s1972_s30 }
  0x9f   : > { %1612 = vmatmul.mubr.msk.bf16.vlgmr.msra.gmra.mrb[0].mxu1 %vm342_vm0, %v354_v14  ;;  %v379_v19 = vrot.slane %v377_v17, 1  ;;  %v535_v29 = vsel %vm532_vm4, %v533_v27, %v534_v28  ;;  %v1822_v60 = vld [vmem:[#allocation10 + $0x54] ss:$8 sps:$4 sm:$0xff]   ;;  %v1820_v63 = vld [vmem:[#allocation10 + $0x50] ss:$8 sps:$4 sm:$0xff]   ;;  %p1970_p7 = pneg %p1969_p3  ;;  %p1975_p2 = scmp.lt.s32.totalorder %s1973_s9, %s1967_s22 }
  0xa0   : > { %754 = vmatpush1.bf16.msra.mxu1 %v1733_v30  ;;  %785 = vmatprep.mubr.bf16.mxu1 %v2053_v43  ;;  %v1823_v4 = vld [vmem:[#allocation10 + $0x60] ss:$8 sps:$4 sm:$0xff]   ;;  %v1828_v6 = vld [vmem:[#allocation10 + $0x74] ss:$8 sps:$4 sm:$0xff]   ;;  %v1826_v9 = vld [vmem:[#allocation10 + $0x70] ss:$8 sps:$4 sm:$0xff]  }
  0xa1   : > { %v380_v22 = vor.u32 %v379_v19, %v375_v16  ;;  %755 = vmatprep.subr.bf16.mxu1 %v1738_v32  ;;  %v1831_v10 = vld [vmem:[#allocation10 + $0x84] ss:$8 sps:$4 sm:$0xff]   ;;  %v1829_v11 = vld [vmem:[#allocation10 + $0x80] ss:$8 sps:$4 sm:$0xff]   ;;  %v1834_v12 = vld [vmem:[#allocation10 + $0x94] ss:$8 sps:$4 sm:$0xff]   ;;  %p1976_p1 = por %p1975_p2, %p1974_p12 }
  0xa2   : > { %v1832_v13 = vld [vmem:[#allocation10 + $0x90] ss:$8 sps:$4 sm:$0xff]   ;;  %v1837_v14 = vld [vmem:[#allocation10 + $0xa4] ss:$8 sps:$4 sm:$0xff]   ;;  %v1835_v19 = vld [vmem:[#allocation10 + $0xa0] ss:$8 sps:$4 sm:$0xff]  }
  0xa3   : > { %v385_v23 = vsel %vm373_vm3, %v380_v22, %v384_v20  ;;  %v1488_v16 = vld [vmem:[%s2419_s2] ss:$0 sm:$0xff]  ;;  %v1843_v28 = vld [vmem:[#allocation10 + $0xc4] ss:$8 sps:$4 sm:$0xff]   ;;  %v1841_v30 = vld [vmem:[#allocation10 + $0xc0] ss:$8 sps:$4 sm:$0xff]   ;;  %p1977_p4 = pnand %p1976_p1, %p1970_p7 }
  0xa4   : > { %1600 = vmatmul.mubr.msk.bf16.vlgmr.msra.gmra.mrb[0].mxu0 %vm342_vm0, %v385_v23  ;;  %756 = vmatpush1.bf16.msra.mxu1 %v1736_v33  ;;  %v1838_v27 = vld [vmem:[#allocation10 + $0xb0] ss:$8 sps:$4 sm:$0xff]   ;;  %v1846_v31 = vld [vmem:[#allocation10 + $0xd4] ss:$8 sps:$4 sm:$0xff]  }
  0xa5   : > { %1616 = vmatpush3.bf16.msra.mxu0 %v1729_v21  ;;  %1623 = vmatprep.mubr.msk.bf16.mxu0 %vm2052_vm2, %v2051_v0  ;;  %v1840_v21 = vld [vmem:[#allocation10 + $0xb4] ss:$8 sps:$4 sm:$0xff]   ;;  %v1844_v32 = vld [vmem:[#allocation10 + $0xd0] ss:$8 sps:$4 sm:$0xff]  }
  0xa6   : > { %1617 = vmatprep.subr.bf16.mxu0 %v2051_v0  ;;  %757 = vmatprep.subr.bf16.mxu1 %v1741_v34 }
  0xa8   : > { %758 = vmatpush1.bf16.msra.mxu1 %v1739_v35 }
  0xa9   : > { %1618 = vmatpush3.bf16.msra.mxu0 %v1730_v24  ;;  %759 = vmatprep.subr.bf16.mxu1 %v1744_v36 }
  0xaa   : > { %1619 = vmatprep.subr.bf16.mxu0 %v2051_v0 }
  0xac   : > { %760 = vmatpush1.bf16.msra.mxu1 %v1742_v37 }
  0xad   : > { %1620 = vmatpush3.bf16.msra.mxu0 %v1731_v25  ;;  %761 = vmatprep.subr.bf16.mxu1 %v1747_v38 }
  0xae   : > { %1621 = vmatprep.subr.bf16.mxu0 %v2051_v0  ;;  %v1825_v0 = vld [vmem:[#allocation10 + $0x64] ss:$8 sps:$4 sm:$0xff]  }
  0xb0   : > { %762 = vmatpush1.bf16.msra.mxu1 %v1745_v39 }
  0xb1   : > { %1622 = vmatpush3.bf16.msra.mxu0 %v1732_v26  ;;  %763 = vmatprep.subr.bf16.mxu1 %v1750_v40 }
  0xb2   : > { %1295 = vmatprep.subr.bf16.mxu0 %v1807_v49  ;;  %v1762_v49 = vld [vmem:[#allocation9 + $0x14] ss:$8 sps:$4 sm:$0xff]  }
  0xb4   : > { %1624 = vmatmul.mubr.msk.bf16.vlgmr.msra.gmra.mrb[4].mxu0 %vm342_vm0, %v535_v29  ;;  %764 = vmatpush1.bf16.msra.mxu1 %v1748_v41 }
  0xb5   : > { %765 = vmatprep.subr.bf16.mxu1 %v1753_v42  ;;  %1296 = vmatpush1.bf16.msra.mxu0 %v1805_v48 }
  0xb6   : > { %1297 = vmatprep.subr.bf16.mxu0 %v1810_v50 }
  0xb8   : > { %766 = vmatpush1.bf16.msra.mxu1 %v1751_v44 }
  0xb9   : > { %767 = vmatprep.subr.bf16.mxu1 %v1756_v45  ;;  %1298 = vmatpush1.bf16.msra.mxu0 %v1808_v51  ;;  %v1760_v51 = vld [vmem:[#allocation9 + $0x10] ss:$8 sps:$4 sm:$0xff]  }
  0xba   : > { %1299 = vmatprep.subr.bf16.mxu0 %v1813_v52  ;;  %v1765_v52 = vld [vmem:[#allocation9 + $0x24] ss:$8 sps:$4 sm:$0xff]  }
  0xbc   : > { %768 = vmatpush1.bf16.msra.mxu1 %v1754_v46  ;;  %v1757_v46 = vld [vmem:[#allocation9] ss:$8 sps:$4 sm:$0xff]  }
  0xbd   : > { %876 = vmatprep.subr.bf16.mxu1 %v1759_v47  ;;  %1300 = vmatpush1.bf16.msra.mxu0 %v1811_v53  ;;  %v1763_v53 = vld [vmem:[#allocation9 + $0x20] ss:$8 sps:$4 sm:$0xff]  }
  0xbe   : > { %1301 = vmatprep.subr.bf16.mxu0 %v1816_v54  ;;  %v1768_v54 = vld [vmem:[#allocation9 + $0x34] ss:$8 sps:$4 sm:$0xff]  }
  0xc1   : > { %1302 = vmatpush1.bf16.msra.mxu0 %v1814_v55  ;;  %v1766_v55 = vld [vmem:[#allocation9 + $0x30] ss:$8 sps:$4 sm:$0xff]  }
  0xc2   : > { %1303 = vmatprep.subr.bf16.mxu0 %v1819_v56  ;;  %v1771_v56 = vld [vmem:[#allocation9 + $0x44] ss:$8 sps:$4 sm:$0xff]  }
  0xc5   : > { %1304 = vmatpush1.bf16.msra.mxu0 %v1817_v58  ;;  %v1774_v58 = vld [vmem:[#allocation9 + $0x54] ss:$8 sps:$4 sm:$0xff]  }
  0xc6   : > { %1305 = vmatprep.subr.bf16.mxu0 %v1822_v60  ;;  %v1777_v60 = vld [vmem:[#allocation9 + $0x64] ss:$8 sps:$4 sm:$0xff]  }
  0xc9   : > { %1306 = vmatpush1.bf16.msra.mxu0 %v1820_v63  ;;  %v1778_v63 = vld [vmem:[#allocation9 + $0x70] ss:$8 sps:$4 sm:$0xff]  }
  0xca   : > { %1307 = vmatprep.subr.bf16.mxu0 %v1825_v0  ;;  %v1783_v0 = vld [vmem:[#allocation9 + $0x104] ss:$8 sps:$4 sm:$0xff]  }
  0xcd   : > { %1308 = vmatpush1.bf16.msra.mxu0 %v1823_v4  ;;  %v1789_v4 = vld [vmem:[#allocation9 + $0x124] ss:$8 sps:$4 sm:$0xff]  }
  0xce   : > { %1309 = vmatprep.subr.bf16.mxu0 %v1828_v6  ;;  %v1792_v6 = vld [vmem:[#allocation9 + $0x134] ss:$8 sps:$4 sm:$0xff]  }
  0xd1   : > { %1310 = vmatpush1.bf16.msra.mxu0 %v1826_v9  ;;  %v1793_v9 = vld [vmem:[#allocation9 + $0x140] ss:$8 sps:$4 sm:$0xff]  }
  0xd2   : > { %1311 = vmatprep.subr.bf16.mxu0 %v1831_v10  ;;  %v1798_v10 = vld [vmem:[#allocation9 + $0x154] ss:$8 sps:$4 sm:$0xff]  }
  0xd5   : > { %1312 = vmatpush1.bf16.msra.mxu0 %v1829_v11  ;;  %v1796_v11 = vld [vmem:[#allocation9 + $0x150] ss:$8 sps:$4 sm:$0xff]  }
  0xd6   : > { %1313 = vmatprep.subr.bf16.mxu0 %v1834_v12  ;;  %v1801_v12 = vld [vmem:[#allocation9 + $0x164] ss:$8 sps:$4 sm:$0xff]  }
  0xd9   : > { %1314 = vmatpush1.bf16.msra.mxu0 %v1832_v13  ;;  %v1804_v13 = vld [vmem:[#allocation9 + $0x174] ss:$8 sps:$4 sm:$0xff]  }
  0xda   : > { %1315 = vmatprep.subr.bf16.mxu0 %v1837_v14  ;;  %v1802_v14 = vld [vmem:[#allocation9 + $0x170] ss:$8 sps:$4 sm:$0xff]  }
  0xdd   : > { %1316 = vmatpush1.bf16.msra.mxu0 %v1835_v19  ;;  %v1071_v19 = vlaneseq }
  0xde   : > { %1317 = vmatprep.subr.bf16.mxu0 %v1840_v21 }
  0xe1   : > { %1318 = vmatpush1.bf16.msra.mxu0 %v1838_v27 }
  0xe2   : > { %1319 = vmatprep.subr.bf16.mxu0 %v1843_v28 }
  0xe5   : > { %1320 = vmatpush1.bf16.msra.mxu0 %v1841_v30 }
  0xe6   : > { %1321 = vmatprep.subr.bf16.mxu0 %v1846_v31 }
  0xe9   : > { %1322 = vmatpush1.bf16.msra.mxu0 %v1844_v32 }
 0x172   : > { %v514_v57 = vpop.f32.mrb[0].mxu1 }
 0x173   : > { %v1613_v59 = vpop.f32.mrb[1].mxu1 }
 0x174   : > { %v517_v61 = vpop.f32.mrb[2].mxu1  ;;  %v1772_v59 = vld [vmem:[#allocation9 + $0x50] ss:$8 sps:$4 sm:$0xff]  }
 0x175   : > { %v1614_v62 = vpop.f32.mrb[3].mxu1 }
 0x176   : > { %v1780_v62 = vld [vmem:[#allocation9 + $0x74] ss:$8 sps:$4 sm:$0xff]  }
 0x177   : > { %v447_v1 = vpop.f32.mrb[0].mxu0 }
 0x178   : > { %v515_v2 = vadd.f32 %v514_v57, %v447_v1  ;;  %v1601_v3 = vpop.f32.mrb[1].mxu0  ;;  %v1769_v57 = vld [vmem:[#allocation9 + $0x40] ss:$8 sps:$4 sm:$0xff]  }
 0x179   : > { %v450_v5 = vpop.f32.mrb[2].mxu0  ;;  %v1781_v1 = vld [vmem:[#allocation9 + $0x100] ss:$8 sps:$4 sm:$0xff]   ;;  %v1784_v3 = vld [vmem:[#allocation9 + $0x110] ss:$8 sps:$4 sm:$0xff]  }
 0x17a   : > { %v518_v7 = vadd.f32 %v517_v61, %v450_v5  ;;  %v1602_v8 = vpop.f32.mrb[3].mxu0  ;;  %v1775_v61 = vld [vmem:[#allocation9 + $0x60] ss:$8 sps:$4 sm:$0xff]  }
 0x17b   : > { %v1787_v5 = vld [vmem:[#allocation9 + $0x120] ss:$8 sps:$4 sm:$0xff]   ;;  %v1795_v8 = vld [vmem:[#allocation9 + $0x144] ss:$8 sps:$4 sm:$0xff]  }
 0x187   : > { %v597_v15 = vpop.f32.mrb[4].mxu0 }
 0x188   : > { %v604_v17 = vadd.f32 %v597_v15, %v515_v2  ;;  %v1625_v18 = vpop.f32.mrb[5].mxu0  ;;  %v1786_v2 = vld [vmem:[#allocation9 + $0x114] ss:$8 sps:$4 sm:$0xff]   ;;  %v1849_v15 = vld [vmem:[#allocation10 + $0xe4] ss:$8 sps:$4 sm:$0xff]  }
 0x189   : > { %v600_v20 = vpop.f32.mrb[6].mxu0  ;;  %1323 = vmatprep.subr.bf16.mxu0 %v1849_v15  ;;  %v1850_v18 = vld [vmem:[#allocation10 + $0xf0] ss:$8 sps:$4 sm:$0xff]  }
 0x18a   : > { %v613_v22 = vadd.f32 %v1488_v16, %v604_v17  ;;  %v605_v23 = vadd.f32 %v600_v20, %v518_v7  ;;  %v1626_v24 = vpop.f32.mrb[7].mxu0  ;;  %v1790_v7 = vld [vmem:[#allocation9 + $0x130] ss:$8 sps:$4 sm:$0xff]   ;;  %v1852_v17 = vld [vmem:[#allocation10 + $0xf4] ss:$8 sps:$4 sm:$0xff]   ;;  %v1072_v20 = vshrl.u32 %v1071_v19, 7 }
 0x18c   : > { %v615_v25 = vmax.f32 %v613_v22, 0.0  ;;  %v614_v26 = vadd.f32 %v1488_v16, %v605_v23  ;;  %v1847_v16 = vld [vmem:[#allocation10 + $0xe0] ss:$8 sps:$4 sm:$0xff]   ;;  %v1073_v21 = vsub.s32 0, %v1072_v20  ;;  %v1069_v22 = vld [vmem:[%s2421_s4] sm:$0x3] }
 0x18d   : > { %1324 = vmatpush1.bf16.msra.mxu0 %v1847_v16  ;;  %v1077_v23 = vsub.s32 1, %v1072_v20 }
 0x18e   : > { %620 = vst [vmem:[#allocation3 + $0x1] sm:$0xff] %v615_v25  ;;  %v616_v29 = vmax.f32 %v614_v26, 0.0  ;;  %1325 = vmatprep.subr.bf16.mxu0 %v1852_v17  ;;  %v1074_v24 = vrot.slane %v1069_v22, %v1073_v21 }
 0x18f   : > { %v1078_v25 = vrot.slane %v1069_v22, %v1077_v23 }
 0x190   : > { %621 = vst [vmem:[#allocation3 + $0x9] sm:$0xff] %v616_v29 }
 0x191   : > { %1326 = vmatpush1.bf16.msra.mxu0 %v1850_v18 }
 0x195   : > { %v622_v33 = vld [vmem:[#allocation3] sm:$0xff] }
 0x197   : > { %v623_v34 = vld [vmem:[#allocation3 + $0x8] sm:$0xff]  ;;  %v624_v35 = vld [vmem:[#allocation3 + $0x10] sm:$0x3] }
 0x198   : > { %v625_v36 = vpack.c.bf16 %v623_v34, %v622_v33  ;;  %v626_v37 = vpack.c.bf16 %v624_v35, %v624_v35 }
 0x19a   : > { %v663_v38 = vshll.u32 %v625_v36, 16  ;;  %v668_v39 = vshll.u32 %v626_v37, 16  ;;  %v938_v40 = vrot.slane %v625_v36, 1  ;;  %v939_v41 = vrot.slane %v626_v37, 1 }
 0x19b   : > { %v661_v42 = vshrl.u32 %v625_v36, 16 }
 0x19c   : > { %v665_v44 = vrot.slane %v663_v38, 1  ;;  %v2354_v45 = vsel %vm532_vm4, %v938_v40, %v939_v41  ;;  %v670_v48 = vrot.slane %v668_v39, 1  ;;  %v1123_v40 = vld [vmem:[%s2423_s6] sm:$0x3] }
 0x19d   : > { %v1128_v41 = vrot.slane %v1123_v40, %v1073_v21 }
 0x19e   : > { %v666_v47 = vor.u32 %v665_v44, %v661_v42  ;;  %v1132_v42 = vrot.slane %v1123_v40, %v1077_v23 }
 0x1a0   : > { %v671_v50 = vsel %vm373_vm3, %v666_v47, %v670_v48 }
 0x1a1   : > { %786 = vmatmul.mubr.bf16.vlgmr.msra.gmra.mrb[4].mxu1 %v671_v50 }
 0x1a2   : > { %877 = vmatpush1.bf16.msra.mxu1 %v1757_v46  ;;  %908 = vmatprep.mubr.bf16.mxu1 %v2053_v43 }
 0x1a3   : > { %878 = vmatprep.subr.bf16.mxu1 %v1762_v49 }
 0x1a6   : > { %879 = vmatpush1.bf16.msra.mxu1 %v1760_v51 }
 0x1a7   : > { %880 = vmatprep.subr.bf16.mxu1 %v1765_v52 }
 0x1aa   : > { %881 = vmatpush1.bf16.msra.mxu1 %v1763_v53 }
 0x1ab   : > { %882 = vmatprep.subr.bf16.mxu1 %v1768_v54 }
 0x1ae   : > { %883 = vmatpush1.bf16.msra.mxu1 %v1766_v55 }
 0x1af   : > { %884 = vmatprep.subr.bf16.mxu1 %v1771_v56 }
 0x1b2   : > { %885 = vmatpush1.bf16.msra.mxu1 %v1769_v57 }
 0x1b3   : > { %886 = vmatprep.subr.bf16.mxu1 %v1774_v58 }
 0x1b6   : > { %887 = vmatpush1.bf16.msra.mxu1 %v1772_v59 }
 0x1b7   : > { %888 = vmatprep.subr.bf16.mxu1 %v1777_v60 }
 0x1ba   : > { %889 = vmatpush1.bf16.msra.mxu1 %v1775_v61 }
 0x1bb   : > { %890 = vmatprep.subr.bf16.mxu1 %v1780_v62 }
 0x1be   : > { %891 = vmatpush1.bf16.msra.mxu1 %v1778_v63 }
 0x1bf   : > { %1022 = vmatprep.subr.bf16.mxu1 %v1783_v0 }
 0x1c1   : > { %909 = vmatmul.mubr.bf16.vlgmr.msra.gmra.mrb[4].mxu1 %v625_v36 }
 0x1c2   : > { %1023 = vmatpush1.bf16.msra.mxu1 %v1781_v1  ;;  %1054 = vmatprep.mubr.bf16.mxu1 %v2053_v43  ;;  %v1799_v43 = vld [vmem:[#allocation9 + $0x160] ss:$8 sps:$4 sm:$0xff]  }
 0x1c3   : > { %1024 = vmatprep.subr.bf16.mxu1 %v1786_v2 }
 0x1c6   : > { %1025 = vmatpush1.bf16.msra.mxu1 %v1784_v3 }
 0x1c7   : > { %1026 = vmatprep.subr.bf16.mxu1 %v1789_v4 }
 0x1ca   : > { %1027 = vmatpush1.bf16.msra.mxu1 %v1787_v5 }
 0x1cb   : > { %1028 = vmatprep.subr.bf16.mxu1 %v1792_v6 }
 0x1ce   : > { %1029 = vmatpush1.bf16.msra.mxu1 %v1790_v7 }
 0x1cf   : > { %1030 = vmatprep.subr.bf16.mxu1 %v1795_v8 }
 0x1d2   : > { %1031 = vmatpush1.bf16.msra.mxu1 %v1793_v9 }
 0x1d3   : > { %1032 = vmatprep.subr.bf16.mxu1 %v1798_v10 }
 0x1d6   : > { %1033 = vmatpush1.bf16.msra.mxu1 %v1796_v11 }
 0x1d7   : > { %1034 = vmatprep.subr.bf16.mxu1 %v1801_v12 }
 0x1da   : > { %1035 = vmatpush1.bf16.msra.mxu1 %v1799_v43 }
 0x1db   : > { %1036 = vmatprep.subr.bf16.mxu1 %v1804_v13 }
 0x1de   : > { %1037 = vmatpush1.bf16.msra.mxu1 %v1802_v14 }
 0x1e1   : > { %1055 = vmatmul.mubr.bf16.vlgmr.msra.gmra.mrb[4].mxu1 %v2354_v45 }
 0x2b4   : > { %v1056_v26 = vpop.f32.mrb[4].mxu1 }
 0x2b5   : > { %v1081_v27 = vadd.f32 %v1074_v24, %v1056_v26  ;;  %v1058_v28 = vpop.f32.mrb[5].mxu1 }
 0x2b6   : > { %v1082_v29 = vadd.f32 %v1078_v25, %v1058_v28  ;;  %v1060_v30 = vpop.f32.mrb[6].mxu1 }
 0x2b7   : > { %v1083_v31 = vadd.f32 %v1074_v24, %v1060_v30  ;;  %v1062_v32 = vpop.f32.mrb[7].mxu1  ;;  %v1085_v34 = vmax.f32 %v1081_v27, 0.0 }
 0x2b8   : > { %v1084_v33 = vadd.f32 %v1078_v25, %v1062_v32  ;;  %v1086_v36 = vmax.f32 %v1082_v29, 0.0 }
 0x2b9   : > { %v1087_v35 = vmax.f32 %v1083_v31, 0.0 }
 0x2ba   : > { %v1088_v37 = vmax.f32 %v1084_v33, 0.0 }
 0x2bb   : > { %v1089_v38 = vpack.c.bf16 %v1087_v35, %v1085_v34 }
 0x2bc   : > { %v1090_v39 = vpack.c.bf16 %v1088_v37, %v1086_v36 }
 0x2be   : > { %1327 = vmatprep.mubr.bf16.mxu0 %v1090_v39 }
 0x2bf   : > { %1328 = vmatmul.mubr.bf16.vlgmr.msra.gmra.mrb[8].mxu0 %v1089_v38 }
 0x392   : > { %v1329_v44 = vpop.f32.mrb[8].mxu0 }
 0x393   : > { %v1330_v45 = vadd.f32 %v1329_v44, %v1128_v41  ;;  %v1331_v46 = vpop.f32.mrb[9].mxu0 }
 0x394   : > { %v1332_v47 = vadd.f32 %v1331_v46, %v1132_v42  ;;  %v1333_v48 = vpop.f32.mrb[10].mxu0 }
 0x395   : > { %1338 = vst [vmem:[%s340_s8] sm:$0xff] %v1330_v45  ;;  %v1334_v49 = vadd.f32 %v1333_v48, %v1128_v41  ;;  %v1335_v50 = vpop.f32.mrb[11].mxu0 }
 0x396   : > { %1339 = vst [vmem:[%s340_s8 + $0x8] sm:$0xff] %v1332_v47  ;;  %v1336_v51 = vadd.f32 %v1335_v50, %v1132_v42 }
 0x397   : > { %1340 = vst [vmem:[%s340_s8 + $0x10] sm:$0xff] %v1334_v49 }
 0x398   : > { %1341 = vst [vmem:[%s340_s8 + $0x18] sm:$0xff] %v1336_v51 }
 0x399   : > { %1980 = shalt.err (!%p1977_p4)
}
 0x39a   : > { %s1981_s29 = scalar_lea.hbm %s2373_s21, 512  ;;  %s1985_s14 = scalar_lea.hbm %s2424_s7, 1024 }
 0x39b   : > { %p1982_p9 = scmp.ne.s32.totalorder %s2373_s21, %s1981_s29  ;;  %p1986_p8 = scmp.lt.u32.totalorder %s2373_s21, %s2424_s7 }
 0x39c   : > { %p1987_p13 = scmp.lt.u32.totalorder %s1985_s14, %s1981_s29  ;;  %p1989_p10 = scmp.lt.u32.totalorder %s1981_s29, %s2373_s21 }
 0x39d   : > { %p1983_p0 = pnand %p1982_p9, %p2245_p5 }
 0x39e   : > { %p1988_p6 = por %p1987_p13, %p1986_p8 }
 0x39f   : > { %p1984_p11 = pneg %p1983_p0 }
 0x3a0   : > { %p1990_p3 = por %p1989_p10, %p1988_p6 }
 0x3a2   : > { %p1991_p7 = pnand %p1990_p3, %p1984_p11 }
 0x3a4   : > { %1994 = shalt.err (!%p1991_p7)
}
 0x3a5   : > { %s2055_s11 = smov 256   ;;  %s2056_s12 = smov 16  }
 0x3a6   : > { %1649 = dma.vmem_to_hbm [thread:$0]  (%p2245_p5), %s2368_s16, 512, %s2373_s21, %s1343_s28, %s2055_s11, %s2055_s11, %s2056_s12  }
 0x3a7 PF: > { %s2446_s19 = sld [smem:[#allocation17_spill]]  ;;  %s1371_s22 = sand.u32 1, %s2029_s24  }
 0x3a8   : > { %p2448_p2 = scmp.ge.s32.totalorder %s2041_s27, 2  ;;  %s1372_s23 = scalar_lea.sflag [#allocation6], %s1371_s22 }
 0x3ad   : > { %p2447_p12 = scmp.ne.s32.totalorder %s2446_s19, 0 }
 0x3af   : > { %p1666_p1 = pnand %p2448_p2, %p2447_p12 }
 0x3b1   : > { %2024 = dma.done.wait (!%p1666_p1), %s1372_s23, 512  }
 0x3b2   : > { %2026 = vsyncadd (!%p1666_p1), %s1372_s23, 4294966784  ;;  %p22_p4 = scmp.ge.s32.totalorder %s2210_s18, 4   ;;  %s2449_s24 = smov %s2033_s25 }
 0x3b3   : > { %s2450_s25 = smov %s2037_s26  ;;  %s2451_s26 = smov %s2241_s13 }
 0x3b4   : > { %s2452_s27 = smov %s2210_s18  ;;  %24 = sbr.rel (!%p22_p4) target bundleno = 9 (0x9), region = 109 }
 0x3bb   :  { %1377 = vsyncpa [#allocation5], 1 }
 0x3bc   :  { %1379 = vsyncpa [#allocation5 + $0x1], 1 }
 0x3bd   :  { %1380 = vsyncpa [#allocation8], 1 }
 0x3be   :  { %1381 = vsyncpa [#allocation11], 1 }
 0x3bf   :  { %1382 = vsyncpa [#allocation6], 1 }
 0x3c0   :  { %1384 = vsyncpa [#allocation6 + $0x1], 1 }

</bundles_post_ra>
